<compile_context>
chip_gen: v5e
topology: v5e:2x2
jax: 0.10.0
libtpu: 0.0.40
codegen_flags: <defaults>
</compile_context>

<pallas_src>
import functools

import jax
import jax.numpy as jnp
import numpy as np
from jax.experimental import pallas as pl
from jax.experimental.pallas import tpu as pltpu

_LANE = 128  # lane width; batch tiles are multiples of this


def _mlp_kernel(x_ref, w_in_ref, b_in_ref, *rest, n_hidden, activation):
    """One batch(-lane) tile of the full MLP forward, transposed layout.

    x_ref:     (dim, TB)           f32   input tile, batch on lanes
    w_in_ref:  (W, dim)            f32   transposed input weights
    b_in_ref:  (W, 1)              f32
    [w_h_ref:  (n_hidden, W, W)    f32]  transposed, only if n_hidden > 0
    [b_h_ref:  (n_hidden, W, 1)    f32]  only if n_hidden > 0
    w_out_ref: (nOut, W)           f32   transposed output weights
    o_ref:     (nOut, TB)          f32   lane-dense output tile
    """
    if n_hidden > 0:
        w_h_ref, b_h_ref, w_out_ref, o_ref = rest
    else:
        w_out_ref, o_ref = rest

    act = (lambda v: jnp.maximum(v, 0.0)) if activation == "relu" else jnp.tanh

    def dense(wt, h, b=None):
        out = jnp.dot(wt, h, preferred_element_type=jnp.float32)
        if b is not None:
            out = out + b          # (W, 1) broadcast across the lane axis
        return out

    h = act(dense(w_in_ref[...], x_ref[...], b_in_ref[...]))

    # n_hidden is static & tiny here, so an unrolled Python loop is fine.
    # TODO(synk): for deep nets (n_hidden >= 8) switch to
    # lax.fori_loop(..., unroll=True) over w_h_ref[l]/b_h_ref[l] so vreg live
    # ranges stay bounded.
    for l in range(n_hidden):
        h = act(dense(w_h_ref[l], h, b_h_ref[l]))

    o_ref[...] = dense(w_out_ref[...], h).astype(o_ref.dtype)


def _round_up(x, m):
    return ((x + m - 1) // m) * m


def net_timestep_forward(S, params, *, activation="relu", tile_b=8192):
    """Pallas forward for Net_timestep.

    S: (B, dim) float32
    params: dict with w_in (dim, W), b_in (1, W),
            w_h (n_hidden, W, W), b_h (n_hidden, 1, W), w_out (W, nOut)
    Returns (B, nOut) float32.
    """
    if activation not in ("relu", "tanh"):
        raise ValueError("unknown activation function {}".format(activation))

    B, dim = S.shape
    W = params["w_in"].shape[1]
    nOut = params["w_out"].shape[1]
    n_hidden = int(params["w_h"].shape[0])

    # Pre-transpose weights once in the wrapper (out_features, in_features).
    f32 = jnp.float32
    w_in_t = params["w_in"].T.astype(f32)                  # (W, dim)
    b_in_t = params["b_in"].T.astype(f32)                  # (W, 1)
    w_out_t = params["w_out"].T.astype(f32)                # (nOut, W)
    if n_hidden > 0:
        w_h_t = jnp.swapaxes(params["w_h"], 1, 2).astype(f32)   # (nH, W, W)
        b_h_t = jnp.swapaxes(params["b_h"], 1, 2).astype(f32)   # (nH, W, 1)

    # Batch lives on the lane axis: pad only to a multiple of 128, then pick
    # the tile so padding waste per grid step stays < 128 rows.
    B_pad = _round_up(B, _LANE)
    max_tile = max(_LANE, _round_up(min(tile_b, B_pad), _LANE))
    num_tiles = pl.cdiv(B_pad, max_tile)
    if num_tiles == 1 and B_pad >= 2 * _LANE:
        num_tiles = 2            # keep both v7x TensorCores busy (parallel axis)
    tile = _round_up(pl.cdiv(B_pad, num_tiles), _LANE)
    B_pad = num_tiles * tile

    x = S.T.astype(f32)                                     # (dim, B)
    if B_pad != B:
        x = jnp.pad(x, ((0, 0), (0, B_pad - B)))

    in_specs = [
        pl.BlockSpec((dim, tile), lambda i: (0, i)),        # batch-tiled input
        pl.BlockSpec((W, dim), lambda i: (0, 0)),
        pl.BlockSpec((W, 1), lambda i: (0, 0)),
    ]
    args = [x, w_in_t, b_in_t]
    if n_hidden > 0:
        in_specs += [
            pl.BlockSpec((n_hidden, W, W), lambda i: (0, 0, 0)),
            pl.BlockSpec((n_hidden, W, 1), lambda i: (0, 0, 0)),
        ]
        args += [w_h_t, b_h_t]
    in_specs.append(pl.BlockSpec((nOut, W), lambda i: (0, 0)))
    args.append(w_out_t)

    kernel = functools.partial(_mlp_kernel, n_hidden=n_hidden,
                               activation=activation)

    out_t = pl.pallas_call(
        kernel,
        out_shape=jax.ShapeDtypeStruct((nOut, B_pad), jnp.float32),
        grid_spec=pltpu.PrefetchScalarGridSpec(
            num_scalar_prefetch=0,
            grid=(num_tiles,),
            in_specs=in_specs,
            out_specs=pl.BlockSpec((nOut, tile), lambda i: (0, i)),
        ),
        compiler_params=pltpu.CompilerParams(
            dimension_semantics=("parallel",)),
    )(*args)

    out_t = out_t[:, :B] if B_pad != B else out_t
    return out_t.T                                          # (B, nOut)


def init_params(key, dim, nOut, n_layers, vNetWidth):
    """Deterministic synthetic parameters matching Net_timestep's shapes."""
    n_hidden = n_layers - 1
    keys = jax.random.split(key, 5)
    scale_in = 1.0 / np.sqrt(dim)
    scale_h = 1.0 / np.sqrt(vNetWidth)
    return {
        "w_in": jax.random.uniform(keys[0], (dim, vNetWidth), jnp.float32,
                                   -scale_in, scale_in),
        "b_in": jax.random.uniform(keys[1], (1, vNetWidth), jnp.float32,
                                   -scale_in, scale_in),
        "w_h": jax.random.uniform(keys[2], (n_hidden, vNetWidth, vNetWidth),
                                  jnp.float32, -scale_h, scale_h),
        "b_h": jax.random.uniform(keys[3], (n_hidden, 1, vNetWidth),
                                  jnp.float32, -scale_h, scale_h),
        "w_out": jax.random.uniform(keys[4], (vNetWidth, nOut), jnp.float32,
                                    -scale_h, scale_h),
    }


def reference_forward(S, params, activation="relu"):
    """Pure-JAX f32 reference (PyTorch-equivalent math, standard layout)."""
    act = (lambda v: jnp.maximum(v, 0.0)) if activation == "relu" else jnp.tanh
    h = act(jnp.dot(S, params["w_in"],
                    preferred_element_type=jnp.float32) + params["b_in"])
    for l in range(params["w_h"].shape[0]):
        h = act(jnp.dot(h, params["w_h"][l],
                        preferred_element_type=jnp.float32) + params["b_h"][l])
    return jnp.dot(h, params["w_out"], preferred_element_type=jnp.float32)


if __name__ == "__main__":
    # Small shapes consistent with Net_timestep(dim, nOut, n_layers, vNetWidth)
    dim, nOut, n_layers, vNetWidth = 4, 2, 3, 32

    key = jax.random.PRNGKey(0)
    k_x, k_x2, k_p = jax.random.split(key, 3)
    params = init_params(k_p, dim, nOut, n_layers, vNetWidth)

    # Case 1: tiny batch (single 128-lane tile after padding).
    S = jax.random.normal(k_x, (16, dim), dtype=jnp.float32)
    out = jax.block_until_ready(net_timestep_forward(S, params, activation="relu"))
    ref = jax.block_until_ready(reference_forward(S, params, "relu"))
    np.testing.assert_allclose(np.asarray(out), np.asarray(ref),
                               rtol=2e-3, atol=2e-3)

    # Case 2: ragged batch -> exercises lane padding + a 2-step parallel grid.
    S2 = jax.random.normal(k_x2, (300, dim), dtype=jnp.float32)
    out2 = jax.block_until_ready(net_timestep_forward(S2, params, activation="tanh"))
    ref2 = jax.block_until_ready(reference_forward(S2, params, "tanh"))
    np.testing.assert_allclose(np.asarray(out2), np.asarray(ref2),
                               rtol=2e-3, atol=2e-3)

    print("KERNEL_OK")
</pallas_src>

<mosaic_0001>
module attributes {stable_mosaic.version = 11 : i64} {
  func.func @_mlp_kernel(%arg0: i32, %arg1: memref<4x128xf32, #tpu.memory_space<vmem>>, %arg2: memref<32x4xf32, #tpu.memory_space<vmem>>, %arg3: memref<32x1xf32, #tpu.memory_space<vmem>>, %arg4: memref<2x32x32xf32, #tpu.memory_space<vmem>>, %arg5: memref<2x32x1xf32, #tpu.memory_space<vmem>>, %arg6: memref<2x32xf32, #tpu.memory_space<vmem>>, %arg7: memref<2x128xf32, #tpu.memory_space<vmem>>) attributes {dimension_semantics = [#tpu.dimension_semantics<parallel>], iteration_bounds = array<i64: 1>, scalar_prefetch = 0 : i64, scratch_operands = 0 : i64, tpu.core_type = #tpu.core_type<tc>, window_params = [{transform_indices = @transform_0, window_bounds = array<i64: 4, 128>}, {pipeline_mode = #tpu.pipeline_mode<synchronous>, transform_indices = @transform_1, window_bounds = array<i64: 32, 4>}, {pipeline_mode = #tpu.pipeline_mode<synchronous>, transform_indices = @transform_2, window_bounds = array<i64: 32, 1>}, {pipeline_mode = #tpu.pipeline_mode<synchronous>, transform_indices = @transform_3, window_bounds = array<i64: 2, 32, 32>}, {pipeline_mode = #tpu.pipeline_mode<synchronous>, transform_indices = @transform_4, window_bounds = array<i64: 2, 32, 1>}, {pipeline_mode = #tpu.pipeline_mode<synchronous>, transform_indices = @transform_5, window_bounds = array<i64: 2, 32>}, {transform_indices = @transform_6, window_bounds = array<i64: 2, 128>}]} {
    %c0 = arith.constant 0 : index
    %c0_0 = arith.constant 0 : index
    %0 = vector.load %arg2[%c0, %c0_0] : memref<32x4xf32, #tpu.memory_space<vmem>>, vector<32x4xf32>
    %c0_1 = arith.constant 0 : index
    %c0_2 = arith.constant 0 : index
    %1 = vector.load %arg1[%c0_1, %c0_2] : memref<4x128xf32, #tpu.memory_space<vmem>>, vector<4x128xf32>
    %c0_3 = arith.constant 0 : index
    %c0_4 = arith.constant 0 : index
    %2 = vector.load %arg3[%c0_3, %c0_4] : memref<32x1xf32, #tpu.memory_space<vmem>>, vector<32x1xf32>
    %cst = arith.constant dense<0.000000e+00> : vector<32x128xf32>
    %3 = tpu.matmul %0, %1, %cst {dimension_numbers = #tpu.dot_dimension_numbers<[1], [0], [0], [1], [0, 0, 1, 1], [], []>} : vector<32x4xf32>, vector<4x128xf32>, vector<32x128xf32> -> vector<32x128xf32>
    %4 = vector.broadcast %2 : vector<32x1xf32> to vector<32x128xf32>
    %5 = arith.addf %3, %4 : vector<32x128xf32>
    %cst_5 = arith.constant 0.000000e+00 : f32
    %6 = vector.broadcast %cst_5 : f32 to vector<32x128xf32>
    %7 = arith.maximumf %5, %6 : vector<32x128xf32>
    %c0_6 = arith.constant 0 : index
    %c0_7 = arith.constant 0 : index
    %c0_8 = arith.constant 0 : index
    %8 = vector.load %arg4[%c0_6, %c0_7, %c0_8] : memref<2x32x32xf32, #tpu.memory_space<vmem>>, vector<1x32x32xf32>
    %9 = vector.shape_cast %8 : vector<1x32x32xf32> to vector<32x32xf32>
    %c0_9 = arith.constant 0 : index
    %c0_10 = arith.constant 0 : index
    %c0_11 = arith.constant 0 : index
    %10 = vector.load %arg5[%c0_9, %c0_10, %c0_11] : memref<2x32x1xf32, #tpu.memory_space<vmem>>, vector<1x32x1xf32>
    %11 = vector.shape_cast %10 : vector<1x32x1xf32> to vector<32x1xf32>
    %cst_12 = arith.constant dense<0.000000e+00> : vector<32x128xf32>
    %12 = tpu.matmul %9, %7, %cst_12 {dimension_numbers = #tpu.dot_dimension_numbers<[1], [0], [0], [1], [0, 0, 1, 1], [], []>} : vector<32x32xf32>, vector<32x128xf32>, vector<32x128xf32> -> vector<32x128xf32>
    %13 = vector.broadcast %11 : vector<32x1xf32> to vector<32x128xf32>
    %14 = arith.addf %12, %13 : vector<32x128xf32>
    %cst_13 = arith.constant 0.000000e+00 : f32
    %15 = vector.broadcast %cst_13 : f32 to vector<32x128xf32>
    %16 = arith.maximumf %14, %15 : vector<32x128xf32>
    %c1 = arith.constant 1 : index
    %c0_14 = arith.constant 0 : index
    %c0_15 = arith.constant 0 : index
    %17 = vector.load %arg4[%c1, %c0_14, %c0_15] : memref<2x32x32xf32, #tpu.memory_space<vmem>>, vector<1x32x32xf32>
    %18 = vector.shape_cast %17 : vector<1x32x32xf32> to vector<32x32xf32>
    %c1_16 = arith.constant 1 : index
    %c0_17 = arith.constant 0 : index
    %c0_18 = arith.constant 0 : index
    %19 = vector.load %arg5[%c1_16, %c0_17, %c0_18] : memref<2x32x1xf32, #tpu.memory_space<vmem>>, vector<1x32x1xf32>
    %20 = vector.shape_cast %19 : vector<1x32x1xf32> to vector<32x1xf32>
    %cst_19 = arith.constant dense<0.000000e+00> : vector<32x128xf32>
    %21 = tpu.matmul %18, %16, %cst_19 {dimension_numbers = #tpu.dot_dimension_numbers<[1], [0], [0], [1], [0, 0, 1, 1], [], []>} : vector<32x32xf32>, vector<32x128xf32>, vector<32x128xf32> -> vector<32x128xf32>
    %22 = vector.broadcast %20 : vector<32x1xf32> to vector<32x128xf32>
    %23 = arith.addf %21, %22 : vector<32x128xf32>
    %cst_20 = arith.constant 0.000000e+00 : f32
    %24 = vector.broadcast %cst_20 : f32 to vector<32x128xf32>
    %25 = arith.maximumf %23, %24 : vector<32x128xf32>
    %c0_21 = arith.constant 0 : index
    %c0_22 = arith.constant 0 : index
    %26 = vector.load %arg6[%c0_21, %c0_22] : memref<2x32xf32, #tpu.memory_space<vmem>>, vector<2x32xf32>
    %cst_23 = arith.constant dense<0.000000e+00> : vector<2x128xf32>
    %27 = tpu.matmul %26, %25, %cst_23 {dimension_numbers = #tpu.dot_dimension_numbers<[1], [0], [0], [1], [0, 0, 1, 1], [], []>} : vector<2x32xf32>, vector<32x128xf32>, vector<2x128xf32> -> vector<2x128xf32>
    %c0_24 = arith.constant 0 : index
    %c0_25 = arith.constant 0 : index
    %28 = vector.load %arg7[%c0_24, %c0_25] : memref<2x128xf32, #tpu.memory_space<vmem>>, vector<2x128xf32>
    tpu.vector_store %arg7[%c0_24, %c0_25], %27 {strides = array<i32>} : memref<2x128xf32, #tpu.memory_space<vmem>>, vector<2x128xf32>,
    return
  }
  func.func @transform_0(%arg0: i32) -> (i32, i32) {
    %c0_i32 = arith.constant 0 : i32
    %c0_i32_0 = arith.constant 0 : i32
    return %c0_i32, %arg0 : i32, i32
  }
  func.func @transform_1(%arg0: i32) -> (i32, i32) {
    %c0_i32 = arith.constant 0 : i32
    %c0_i32_0 = arith.constant 0 : i32
    %c0_i32_1 = arith.constant 0 : i32
    return %c0_i32, %c0_i32_0 : i32, i32
  }
  func.func @transform_2(%arg0: i32) -> (i32, i32) {
    %c0_i32 = arith.constant 0 : i32
    %c0_i32_0 = arith.constant 0 : i32
    %c0_i32_1 = arith.constant 0 : i32
    return %c0_i32, %c0_i32_0 : i32, i32
  }
  func.func @transform_3(%arg0: i32) -> (i32, i32, i32) {
    %c0_i32 = arith.constant 0 : i32
    %c0_i32_0 = arith.constant 0 : i32
    %c0_i32_1 = arith.constant 0 : i32
    %c0_i32_2 = arith.constant 0 : i32
    return %c0_i32, %c0_i32_0, %c0_i32_1 : i32, i32, i32
  }
  func.func @transform_4(%arg0: i32) -> (i32, i32, i32) {
    %c0_i32 = arith.constant 0 : i32
    %c0_i32_0 = arith.constant 0 : i32
    %c0_i32_1 = arith.constant 0 : i32
    %c0_i32_2 = arith.constant 0 : i32
    return %c0_i32, %c0_i32_0, %c0_i32_1 : i32, i32, i32
  }
  func.func @transform_5(%arg0: i32) -> (i32, i32) {
    %c0_i32 = arith.constant 0 : i32
    %c0_i32_0 = arith.constant 0 : i32
    %c0_i32_1 = arith.constant 0 : i32
    return %c0_i32, %c0_i32_0 : i32, i32
  }
  func.func @transform_6(%arg0: i32) -> (i32, i32) {
    %c0_i32 = arith.constant 0 : i32
    %c0_i32_0 = arith.constant 0 : i32
    return %c0_i32, %arg0 : i32, i32
  }
}

</mosaic_0001>

<bundles_post_ra>
// kernel: tpu_custom_call.1
= control target key start
LH: loop header
LB: loop body
LE: loop exit
PB: predicated region body
PF: predicated region fallthrough
CT: control target
= control target key end

     0   :  { %vm66_vm0 = vcmask 1043456   ;;  %vm53_vm1 = vcmask 31744   ;;  %v354_v2 = vmov 0   ;;  %s485_s0 = inlined_call_operand.vmem [shape: f32[4,128], index: 0, kind: input, shape index: {}]   ;;  %s486_s1 = inlined_call_operand.vmem [shape: f32[32,4], index: 1, kind: input, shape index: {}]   ;;  %s487_s2 = inlined_call_operand.vmem [shape: f32[32,1], index: 2, kind: input, shape index: {}]   ;;  %s488_s3 = inlined_call_operand.vmem [shape: f32[2,32,32], index: 3, kind: input, shape index: {}]   ;;  %s489_s4 = inlined_call_operand.vmem [shape: f32[2,32,1], index: 4, kind: input, shape index: {}]   ;;  %s490_s5 = inlined_call_operand.vmem [shape: f32[2,32], index: 5, kind: input, shape index: {}]   ;;  %s491_s6 = inlined_call_operand.hbm [shape: f32[2,128], index: 6, kind: output, shape index: {}]  }
   0x1   :  { %v28_v0 = vld [vmem:[%s485_s0] sm:$0xf]  ;;  %326 = vset.pattern.permute.xlu1 %v354_v2  ;;  %v30_v3 = vld [vmem:[%s487_s2 + $0x8] sm:$0xff]  ;;  %v32_v4 = vld [vmem:[%s487_s2 + $0x18] sm:$0xff]  ;;  %325 = vset.pattern.permute.xlu0 %v354_v2 }
   0x2   :  { %v24_v1 = vld [vmem:[%s486_s1] sm:$0xff]  ;;  %293 = vmatpush.msk.msra.mxu0 %vm66_vm0, %v28_v0  ;;  %40 = vperm.xlu1 %326, %v30_v3  }
   0x3   :  { %294 = vmatmul.msk.f32.vlgmr.msra.gmra.mxu0 %vm53_vm1, %v24_v1  ;;  %327 = vset.pattern.permute.xlu2 %v354_v2 }
   0x4   :  { %50 = vperm.xlu0 %325, %v32_v4  }
   0x5   :  { %11 = vsyncpa [#allocation3], 0  ;;  %v25_v5 = vld [vmem:[%s486_s1 + $0x8] sm:$0xff]  ;;  %v29_v6 = vld [vmem:[%s487_s2] sm:$0xff]  ;;  %vm131_vm2 = vcmask 261120   ;;  %s355_s18 = smov [#allocation2]  }
   0x6   :  { %v31_v7 = vld [vmem:[%s487_s2 + $0x10] sm:$0xff]  ;;  %v107_v9 = vld [vmem:[%s489_s4] sm:$0xff]  ;;  %v108_v10 = vld [vmem:[%s489_s4 + $0x8] sm:$0xff]  ;;  %s282_s19 = sshll.u32 %s355_s18, 4  ;;  %s284_s22 = sshll.u32 %s491_s6, 4  ;;  %s283_s19 = int_to_ptr.vmem [resolvable:$true] %s282_s19  ;;  %s285_s22 = int_to_ptr.hbm [resolvable:$true] %s284_s22 }
   0x7   :  { %v26_v8 = vld [vmem:[%s486_s1 + $0x10] sm:$0xff]  ;;  %v27_v11 = vld [vmem:[%s486_s1 + $0x18] sm:$0xff]  ;;  %v307_v12 = vld [vmem:[%s489_s4 + $0x28] sm:$0xff] }
   0x8   :  { %v308_v13 = vld [vmem:[%s489_s4 + $0x30] sm:$0xff]  ;;  %v110_v19 = vld [vmem:[%s489_s4 + $0x18] sm:$0xff]  ;;  %v103_v32 = vld [vmem:[%s488_s3] sm:$0xff] }
   0x9   :  { %128 = vperm.xlu2 %327, %v110_v19   ;;  %v109_v27 = vld [vmem:[%s489_s4 + $0x10] sm:$0xff]  ;;  %v106_v33 = vld [vmem:[%s488_s3 + $0x18] sm:$0xff]  ;;  %v104_v35 = vld [vmem:[%s488_s3 + $0x8] sm:$0xff] }
   0xa   :  { %35 = vperm.xlu1 %326, %v29_v6   ;;  %v309_v34 = vld [vmem:[%s489_s4 + $0x38] sm:$0xff]  ;;  %v306_v36 = vld [vmem:[%s489_s4 + $0x20] sm:$0xff]  ;;  %v105_v37 = vld [vmem:[%s488_s3 + $0x10] sm:$0xff] }
   0xb   :  { %295 = vmatmul.msk.f32.gmra.mxu0 %vm53_vm1, %v25_v5  ;;  %v302_v54 = vld [vmem:[%s488_s3 + $0x20] sm:$0xff]  ;;  %v305_v55 = vld [vmem:[%s488_s3 + $0x38] sm:$0xff]  ;;  %v303_v56 = vld [vmem:[%s488_s3 + $0x28] sm:$0xff] }
   0xc   :  { %45 = vperm.xlu0 %325, %v31_v7   ;;  %v304_v57 = vld [vmem:[%s488_s3 + $0x30] sm:$0xff] }
  0x11   :  { %123 = vperm.xlu2 %327, %v109_v27  }
  0x12   :  { %113 = vperm.xlu1 %326, %v107_v9  }
  0x13   :  { %296 = vmatmul.msk.f32.gmra.mxu0 %vm53_vm1, %v26_v8 }
  0x14   :  { %118 = vperm.xlu0 %325, %v108_v10   ;;  %v252_v10 = vld [vmem:[%s490_s5] sm:$0x3] }
  0x19   :  { %204 = vperm.xlu2 %327, %v309_v34  }
  0x1a   :  { %194 = vperm.xlu1 %326, %v307_v12  }
  0x1b   :  { %297 = vmatmul.msk.f32.gmra.mxu0 %vm53_vm1, %v27_v11 }
  0x1c   :  { %199 = vperm.xlu0 %325, %v308_v13  }
  0x21   :  { %189 = vperm.xlu2 %327, %v306_v36  }
  0x63   :  { %v129_v39 = vpop.permute.xlu2 %128 }
  0x6b   :  { %v124_v45 = vpop.permute.xlu2 %123 }
  0x73   :  { %v205_v58 = vpop.permute.xlu2 %204 }
  0x74   :  { %v41_v17 = vpop.permute.xlu1 %40 }
  0x76   :  { %v51_v16 = vpop.permute.xlu0 %50 }
  0x7b   :  { %v190_v5 = vpop.permute.xlu2 %189 }
  0x7c   :  { %v36_v24 = vpop.permute.xlu1 %35 }
  0x7e   :  { %v46_v20 = vpop.permute.xlu0 %45 }
  0x80   :  { %v87_v14 = vpop.f32.mrf.mxu0 }
  0x81   :  { %v88_v28 = vadd.f32 %v87_v14, %v36_v24 }
  0x83   :  { %v99_v31 = vmax.f32 %v88_v28, 0.0 }
  0x84   :  { %v114_v49 = vpop.permute.xlu1 %113 }
  0x86   :  { %v119_v44 = vpop.permute.xlu0 %118 }
  0x88   :  { %v90_v15 = vpop.f32.mrf.mxu0 }
  0x89   :  { %v91_v25 = vadd.f32 %v90_v15, %v41_v17 }
  0x8b   :  { %v100_v30 = vmax.f32 %v91_v25, 0.0 }
  0x8c   :  { %v195_v0 = vpop.permute.xlu1 %194 }
  0x8e   :  { %v200_v1 = vpop.permute.xlu0 %199 }
  0x90   :  { %v93_v18 = vpop.f32.mrf.mxu0 }
  0x91   :  { %v94_v22 = vadd.f32 %v93_v18, %v46_v20 }
  0x93   :  { %v101_v29 = vmax.f32 %v94_v22, 0.0 }
  0x98   :  { %v96_v21 = vpop.f32.mrf.mxu0 }
  0x99   :  { %v97_v23 = vadd.f32 %v96_v21, %v51_v16 }
  0x9b   :  { %v102_v26 = vmax.f32 %v97_v23, 0.0 }
  0x9d   :  { %156 = vmatpush.msra.mxu1 %v102_v26  ;;  %315 = vmatpush.msra.mxu3 %v102_v26 }
  0x9f   :  { %157 = vmatpush.msra.mxu1 %v101_v29  ;;  %316 = vmatpush.msra.mxu3 %v101_v29 }
  0xa1   :  { %158 = vmatpush.msra.mxu1 %v100_v30  ;;  %317 = vmatpush.msra.mxu3 %v100_v30 }
  0xa3   :  { %159 = vmatpush.msra.mxu1 %v99_v31  ;;  %318 = vmatpush.msra.mxu3 %v99_v31 }
  0xa4   :  { %298 = vmatmul.msk.f32.vlgmr.msra.gmra.mxu1 %vm131_vm2, %v103_v32  ;;  %301 = vmatmul.msk.f32.vlgmr.msra.gmra.mxu3 %vm131_vm2, %v106_v33 }
  0xac   :  { %299 = vmatmul.msk.f32.gmra.mxu1 %vm131_vm2, %v104_v35 }
  0xb4   :  { %300 = vmatmul.msk.f32.gmra.mxu1 %vm131_vm2, %v105_v37 }
 0x121   :  { %v161_v38 = vpop.f32.mrf.mxu1 }
 0x122   :  { %v162_v50 = vadd.f32 %v161_v38, %v114_v49 }
 0x124   :  { %v173_v53 = vmax.f32 %v162_v50, 0.0 }
 0x127   :  { %v170_v40 = vpop.f32.mrf.mxu3 }
 0x128   :  { %v171_v41 = vadd.f32 %v170_v40, %v129_v39 }
 0x129   :  { %v164_v42 = vpop.f32.mrf.mxu1 }
 0x12a   :  { %v176_v43 = vmax.f32 %v171_v41, 0.0  ;;  %v165_v47 = vadd.f32 %v164_v42, %v119_v44 }
 0x12c   :  { %231 = vmatpush.msra.mxu2 %v176_v43  ;;  %319 = vmatpush.msrb.mxu3 %v176_v43  ;;  %v174_v52 = vmax.f32 %v165_v47, 0.0 }
 0x131   :  { %v167_v46 = vpop.f32.mrf.mxu1 }
 0x132   :  { %v168_v48 = vadd.f32 %v167_v46, %v124_v45 }
 0x134   :  { %v175_v51 = vmax.f32 %v168_v48, 0.0 }
 0x136   :  { %232 = vmatpush.msra.mxu2 %v175_v51  ;;  %320 = vmatpush.msrb.mxu3 %v175_v51 }
 0x138   :  { %233 = vmatpush.msra.mxu2 %v174_v52  ;;  %321 = vmatpush.msrb.mxu3 %v174_v52 }
 0x13a   :  { %234 = vmatpush.msra.mxu2 %v173_v53  ;;  %322 = vmatpush.msrb.mxu3 %v173_v53 }
 0x13b   :  { %310 = vmatmul.msk.f32.vlgmr.msra.gmra.mxu2 %vm131_vm2, %v302_v54  ;;  %313 = vmatmul.msk.f32.vlgmr.msrb.gmra.mxu3 %vm131_vm2, %v305_v55 }
 0x143   :  { %311 = vmatmul.msk.f32.gmra.mxu2 %vm131_vm2, %v303_v56 }
 0x14b   :  { %312 = vmatmul.msk.f32.gmra.mxu2 %vm131_vm2, %v304_v57 }
 0x1be   :  { %v236_v59 = vpop.f32.mrf.mxu2  ;;  %v245_v60 = vpop.f32.mrf.mxu3 }
 0x1bf   :  { %v246_v61 = vadd.f32 %v245_v60, %v205_v58  ;;  %v237_v6 = vadd.f32 %v236_v59, %v190_v5 }
 0x1c1   :  { %v251_v62 = vmax.f32 %v246_v61, 0.0  ;;  %v248_v9 = vmax.f32 %v237_v6, 0.0 }
 0x1c3   :  { %268 = vmatpush.msra.mxu3 %v251_v62 }
 0x1c6   :  { %v239_v63 = vpop.f32.mrf.mxu2 }
 0x1c7   :  { %v240_v3 = vadd.f32 %v239_v63, %v195_v0 }
 0x1c9   :  { %v249_v8 = vmax.f32 %v240_v3, 0.0 }
 0x1ce   :  { %v242_v2 = vpop.f32.mrf.mxu2 }
 0x1cf   :  { %v243_v4 = vadd.f32 %v242_v2, %v200_v1 }
 0x1d1   :  { %v250_v7 = vmax.f32 %v243_v4, 0.0 }
 0x1d3   :  { %269 = vmatpush.msra.mxu3 %v250_v7 }
 0x1d5   :  { %270 = vmatpush.msra.mxu3 %v249_v8 }
 0x1d7   :  { %271 = vmatpush.msra.mxu3 %v248_v9 }
 0x1d8   :  { %314 = vmatmul.msk.f32.vlgmr.msra.gmra.mxu3 %vm131_vm2, %v252_v10 }
 0x25b   :  { %v273_v11 = vpop.f32.mrf.mxu3 }
 0x25c   :  { %276 = vst [vmem:[#allocation2] sm:$0x3] %v273_v11 }
 0x25d   :  { %287 = dma.vmem_to_hbm [thread:$0]  %s283_s19, 32, %s285_s22, [#allocation3]  }
 0x25e   :  { %352 = dma.done.wait [#allocation3], 32  }
 0x25f   :  { %353 = vsyncadd [#allocation3], 4294967264 }
 0x260   :  { %292 = vsyncpa [#allocation3], 1 }

</bundles_post_ra>
